<compile_context>
chip_gen: v5e
topology: v5e:2x2
jax: 0.10.0
libtpu: 0.0.40
codegen_flags: <defaults>
</compile_context>

<pallas_src>
import functools
import math

import jax
import jax.numpy as jnp
from jax.experimental import pallas as pl
from jax.experimental.pallas import tpu as pltpu


def _round_up(x, m):
    return (x + m - 1) // m * m


# ---------------------------------------------------------------------------
# Pallas kernel: one (row-tile, cout-tile) of the fused GEMM + bias epilogue.
#   x_ref : (TM, Kc)   bf16  gathered features, all K^3 offsets fused
#   w_ref : (Kc, TN)   bf16  flattened weights (resident across row tiles)
#   b_ref : (1,  TN)   f32   bias (zeros when the module has bias=False)
#   o_ref : (TM, TN)   f32   lane-dense output tile
# ---------------------------------------------------------------------------
def _fused_gemm_kernel(x_ref, w_ref, b_ref, o_ref):
    acc = jnp.dot(x_ref[...], w_ref[...], preferred_element_type=jnp.float32)
    o_ref[...] = acc + b_ref[...]


# ---------------------------------------------------------------------------
# Kernel-map construction (plain-JAX glue): sort + searchsorted, no N^2 blowup.
# ---------------------------------------------------------------------------
def build_kernel_map(coords, kernel_size, dilation):
    """nbr[k, i] = j with coords[j] == coords[i] + offset_k * dilation, else -1.

    Assumes unique voxel coordinates (duplicates silently resolve to one of
    them — same caveat as torchsparse's hash map).
    """
    N = coords.shape[0]
    r = kernel_size // 2
    offsets = jnp.array(
        [(a, b, c)
         for a in range(-r, r + 1)
         for b in range(-r, r + 1)
         for c in range(-r, r + 1)], dtype=jnp.int32) * dilation          # (K3, 3)

    m = r * dilation
    shifted = coords - coords.min(axis=0) + m                             # >= m
    dims = shifted.max(axis=0) + m + 1                                    # (3,)

    def linearize(c):
        return (c[..., 0] * dims[1] + c[..., 1]) * dims[2] + c[..., 2]

    keys = linearize(shifted)                                             # (N,)
    order = jnp.argsort(keys)
    sorted_keys = keys[order]

    tkeys = linearize(shifted[None, :, :] + offsets[:, None, :])          # (K3, N)
    pos = jnp.clip(jnp.searchsorted(sorted_keys, tkeys), 0, N - 1)
    found = sorted_keys[pos] == tkeys
    return jnp.where(found, order[pos], -1).astype(jnp.int32)             # (K3, N)


# ---------------------------------------------------------------------------
# Wrapper == Conv3d.forward (stride=1, non-transposed path).
# ---------------------------------------------------------------------------
def sparse_conv3d(feats, coords, kernel, bias=None, *, kernel_size=3,
                  stride=1, dilation=1, transpose=False):
    # TODO(synk): stride > 1 downsampling and transposed conv require
    # torchsparse's output-coordinate generation / inverse kernel maps
    # (host-side hash-map logic) with no clean Pallas equivalent.
    assert stride == 1 and not transpose, "only stride=1, non-transposed path"

    N, Cin = feats.shape
    if kernel_size == 1:
        W = kernel.reshape(1, Cin, -1)                                    # (1, Cin, Cout)
        nbr = jnp.arange(N, dtype=jnp.int32)[None, :]                     # identity map
    else:
        W = kernel                                                        # (K3, Cin, Cout)
        nbr = build_kernel_map(coords.astype(jnp.int32), kernel_size, dilation)
    K3, _, Cout = W.shape
    Kc = K3 * Cin

    # --- gather (XLA glue): build the (N, K3*Cin) slab in bf16; invalid
    #     neighbors are redirected to an appended zero row (no select pass).
    # TODO(synk): for production-scale N, an in-kernel DMA row-gather driven by
    # scalar-prefetched indices would avoid materializing the slab in HBM.
    feats_bf = feats.astype(jnp.bfloat16)
    feats_pad = jnp.concatenate(
        [feats_bf, jnp.zeros((1, Cin), jnp.bfloat16)], axis=0)            # (N+1, Cin)
    nbr_t = nbr.T                                                         # (N, K3)
    idx = jnp.where(nbr_t >= 0, nbr_t, N)                                 # invalid -> zero row
    slab = jnp.take(feats_pad, idx.reshape(-1), axis=0).reshape(N, Kc)    # (N, K3*Cin) bf16

    # --- tile-size selection against a conservative VMEM budget.
    Cout_pad = _round_up(Cout, 128)
    TN = min(Cout_pad, 512)
    while TN > 128 and Kc * TN * 2 > 16 * 1024 * 1024:                    # resident weights
        TN //= 2

    def _vmem_bytes(tm):
        return (2 * tm * Kc * 2          # slab tile, double-buffered (bf16)
                + 2 * tm * TN * 4        # out tile, double-buffered (f32)
                + Kc * TN * 2            # resident weight tile (bf16)
                + TN * 4)                # bias

    TM = 512
    while TM > 8 and _vmem_bytes(TM) > 24 * 1024 * 1024:
        TM //= 2
    TM = min(TM, _round_up(N, 8))
    N_pad = _round_up(N, TM)

    Wf = jnp.pad(W.reshape(Kc, Cout).astype(jnp.bfloat16),
                 ((0, 0), (0, Cout_pad - Cout)))
    b = (jnp.zeros((1, Cout), jnp.float32) if bias is None
         else bias.reshape(1, Cout).astype(jnp.float32))
    b = jnp.pad(b, ((0, 0), (0, Cout_pad - Cout)))
    slab = jnp.pad(slab, ((0, N_pad - N), (0, 0)))

    out = pl.pallas_call(
        _fused_gemm_kernel,
        out_shape=jax.ShapeDtypeStruct((N_pad, Cout_pad), jnp.float32),
        grid=(N_pad // TM, Cout_pad // TN),
        in_specs=[
            pl.BlockSpec((TM, Kc), lambda i, j: (i, 0)),       # gathered slab tile
            pl.BlockSpec((Kc, TN), lambda i, j: (0, j)),       # weights (resident per j)
            pl.BlockSpec((1, TN), lambda i, j: (0, j)),        # bias (resident per j)
        ],
        out_specs=pl.BlockSpec((TM, TN), lambda i, j: (i, j)),
        compiler_params=pltpu.CompilerParams(
            dimension_semantics=("parallel", "parallel"),      # megacore / dual-TC
            vmem_limit_bytes=32 * 1024 * 1024),
    )(slab, Wf, b)
    return out[:N, :Cout]


# ---------------------------------------------------------------------------
# Plain-JAX reference (same math, dense einsum) for a correctness check.
# ---------------------------------------------------------------------------
def sparse_conv3d_ref(feats, coords, kernel, bias, kernel_size, dilation):
    if kernel_size == 1:
        out = feats @ kernel
    else:
        nbr = build_kernel_map(coords, kernel_size, dilation)             # (K3, N)
        gath = jnp.where((nbr >= 0)[..., None], feats[jnp.clip(nbr, 0)], 0.0)
        out = jnp.einsum("kni,kio->no", gath, kernel)
    if bias is not None:
        out = out + bias[None, :]
    return out


if __name__ == "__main__":
    # Module config (defaults: stride=1, dilation=1, bias=False, transpose=False)
    in_channels, out_channels, kernel_size = 32, 64, 3
    N = 64            # number of active (sparse) voxels
    grid_size = 8     # voxels live on an 8x8x8 grid

    key = jax.random.PRNGKey(0)
    k_coord, k_feat, k_w = jax.random.split(key, 3)

    # Unique voxel coordinates (deterministic; kernel map assumes uniqueness).
    voxel_ids = jax.random.choice(k_coord, grid_size ** 3, shape=(N,),
                                  replace=False)
    coords = jnp.stack([voxel_ids // (grid_size * grid_size),
                        (voxel_ids // grid_size) % grid_size,
                        voxel_ids % grid_size], axis=-1).astype(jnp.int32)

    feats = jax.random.normal(k_feat, (N, in_channels), jnp.float32)

    # Deterministic init matching Conv3d.init_weight (uniform(-std, std)).
    std = 1.0 / math.sqrt(in_channels * kernel_size ** 3)
    kernel = jax.random.uniform(k_w, (kernel_size ** 3, in_channels, out_channels),
                                jnp.float32, -std, std)
    bias = None  # module default bias=False

    conv = jax.jit(functools.partial(sparse_conv3d, kernel_size=kernel_size,
                                     stride=1, dilation=1, transpose=False))
    out = conv(feats, coords, kernel, bias)
    out = jax.block_until_ready(out)

    ref = sparse_conv3d_ref(feats, coords, kernel, bias, kernel_size, 1)
    assert out.shape == (N, out_channels)
    # bf16 operands with f32 accumulation -> slightly looser tolerance than f32.
    assert jnp.allclose(out, ref, atol=2e-2, rtol=2e-2), \
        f"max abs err {jnp.max(jnp.abs(out - ref))}"

    print("KERNEL_OK")
</pallas_src>

<mosaic_0001>
module attributes {stable_mosaic.version = 11 : i64} {
  func.func @_fused_gemm_kernel(%arg0: i32, %arg1: i32, %arg2: memref<64x864xbf16, #tpu.memory_space<vmem>>, %arg3: memref<864x128xbf16, #tpu.memory_space<vmem>>, %arg4: memref<1x128xf32, #tpu.memory_space<vmem>>, %arg5: memref<64x128xf32, #tpu.memory_space<vmem>>) attributes {dimension_semantics = [#tpu.dimension_semantics<parallel>, #tpu.dimension_semantics<parallel>], iteration_bounds = array<i64: 1, 1>, scalar_prefetch = 0 : i64, scratch_operands = 0 : i64, tpu.core_type = #tpu.core_type<tc>, window_params = [{transform_indices = @transform_0, window_bounds = array<i64: 64, 864>}, {transform_indices = @transform_1, window_bounds = array<i64: 864, 128>}, {transform_indices = @transform_2, window_bounds = array<i64: 1, 128>}, {transform_indices = @transform_3, window_bounds = array<i64: 64, 128>}]} {
    %c0 = arith.constant 0 : index
    %c0_0 = arith.constant 0 : index
    %0 = vector.load %arg2[%c0, %c0_0] : memref<64x864xbf16, #tpu.memory_space<vmem>>, vector<64x864xbf16>
    %c0_1 = arith.constant 0 : index
    %c0_2 = arith.constant 0 : index
    %1 = vector.load %arg3[%c0_1, %c0_2] : memref<864x128xbf16, #tpu.memory_space<vmem>>, vector<864x128xbf16>
    %cst = arith.constant dense<0.000000e+00> : vector<64x128xf32>
    %2 = tpu.matmul %0, %1, %cst {dimension_numbers = #tpu.dot_dimension_numbers<[1], [0], [0], [1], [0, 0, 1, 1], [], []>} : vector<64x864xbf16>, vector<864x128xbf16>, vector<64x128xf32> -> vector<64x128xf32>
    %c0_3 = arith.constant 0 : index
    %c0_4 = arith.constant 0 : index
    %3 = vector.load %arg4[%c0_3, %c0_4] : memref<1x128xf32, #tpu.memory_space<vmem>>, vector<1x128xf32>
    %4 = vector.broadcast %3 : vector<1x128xf32> to vector<64x128xf32>
    %5 = arith.addf %2, %4 : vector<64x128xf32>
    %c0_5 = arith.constant 0 : index
    %c0_6 = arith.constant 0 : index
    %6 = vector.load %arg5[%c0_5, %c0_6] : memref<64x128xf32, #tpu.memory_space<vmem>>, vector<64x128xf32>
    tpu.vector_store %arg5[%c0_5, %c0_6], %5 {strides = array<i32>} : memref<64x128xf32, #tpu.memory_space<vmem>>, vector<64x128xf32>,
    return
  }
  func.func @transform_0(%arg0: i32, %arg1: i32) -> (i32, i32) {
    %c0_i32 = arith.constant 0 : i32
    %c0_i32_0 = arith.constant 0 : i32
    return %arg0, %c0_i32 : i32, i32
  }
  func.func @transform_1(%arg0: i32, %arg1: i32) -> (i32, i32) {
    %c0_i32 = arith.constant 0 : i32
    %c0_i32_0 = arith.constant 0 : i32
    return %c0_i32, %arg1 : i32, i32
  }
  func.func @transform_2(%arg0: i32, %arg1: i32) -> (i32, i32) {
    %c0_i32 = arith.constant 0 : i32
    %c0_i32_0 = arith.constant 0 : i32
    return %c0_i32, %arg1 : i32, i32
  }
  func.func @transform_3(%arg0: i32, %arg1: i32) -> (i32, i32) {
    %c0_i32 = arith.constant 0 : i32
    return %arg0, %arg1 : i32, i32
  }
}

</mosaic_0001>

<bundles_post_ra>
// kernel: custom-call
= control target key start
LH: loop header
LB: loop body
LE: loop exit
PB: predicated region body
PF: predicated region fallthrough
CT: control target
= control target key end

     0   :  { %s6_s0 = inlined_call_operand.vmem [shape: u32[27,64], index: 0, kind: output, shape index: {}]  }

// kernel: squeeze.6
= control target key start
LH: loop header
LB: loop body
LE: loop exit
PB: predicated region body
PF: predicated region fallthrough
CT: control target
= control target key end

     0   :  { %vm3_vm0 = vcmask 523264   ;;  %s29_s10 = smov 64   ;;  %s61_s0 = inlined_call_operand.vmem [shape: s32[1728], index: 0, kind: input, shape index: {}]   ;;  %s62_s1 = inlined_call_operand.vmem [shape: s32[27,64], index: 1, kind: output, shape index: {}]  }
   0x1   :  { %v10_v0 = vld [vmem:[%s61_s0] sm:$0xff]   ;;  %v23_v1 = vld [vmem:[%s61_s0 + $0x8] sm:$0x3f]  }
   0x2   :  { %11 = vrot.lane.b32.xlu0 %v10_v0, %s29_s10  ;;  %4 = vst.msk [vmem:[%s62_s1] ss:$2 sm:$0xff] %vm3_vm0, %v10_v0   ;;  %v26_v2 = vld [vmem:[%s61_s0 + $0x8] sm:$0x1f]  }
   0x3   :  { %24 = vst.msk [vmem:[%s62_s1 + $0x10] ss:$2 sm:$0x3f] %vm3_vm0, %v23_v1  }
   0xa   :  { %18 = vrot.lane.b32.xlu0 %v26_v2, %s29_s10 }
  0x74   :  { %v12_v3 = vpop.permute.xlu0 %11  }
  0x75   :  { %25 = vst.msk [vmem:[%s62_s1 + $0x1] ss:$2 sm:$0xff] %vm3_vm0, %v12_v3  }
  0x7c   :  { %v19_v4 = vpop.permute.xlu0 %18  }
  0x7d   :  { %27 = vst.msk [vmem:[%s62_s1 + $0x11] ss:$2 sm:$0x1f] %vm3_vm0, %v19_v4  }

// kernel: sparse_conv3d.1
= control target key start
LH: loop header
LB: loop body
LE: loop exit
PB: predicated region body
PF: predicated region fallthrough
CT: control target
= control target key end

     0   :  { %s1766_s0 = inlined_call_operand.vmem [shape: bf16[64,864], index: 0, kind: input, shape index: {}]   ;;  %s1767_s1 = inlined_call_operand.vmem [shape: bf16[864,128], index: 1, kind: input, shape index: {}]   ;;  %s1768_s2 = inlined_call_operand.vmem [shape: f32[1,128], index: 2, kind: input, shape index: {}]   ;;  %s1769_s3 = inlined_call_operand.hbm [shape: f32[64,128], index: 3, kind: output, shape index: {}]  }
   0x1   :  { %v1233_v0 = vld [vmem:[%s1767_s1 + $0x38] sm:$0xff]  ;;  %v1232_v3 = vld [vmem:[%s1767_s1 + $0x30] sm:$0xff]  ;;  %v1231_v6 = vld [vmem:[%s1767_s1 + $0x28] sm:$0xff] }
   0x2   :  { %v1241_v1 = vld [vmem:[%s1767_s1 + $0x78] sm:$0xff]  ;;  %637 = vmatpush.bf16.msra.mxu0 %v1233_v0  ;;  %1280 = vmatpush.bf16.msra.mxu3 %v1233_v0  ;;  %v1240_v4 = vld [vmem:[%s1767_s1 + $0x70] sm:$0xff]  ;;  %v1239_v7 = vld [vmem:[%s1767_s1 + $0x68] sm:$0xff] }
   0x3   :  { %v1249_v2 = vld [vmem:[%s1767_s1 + $0xb8] sm:$0xff]  ;;  %666 = vmatpush.bf16.msra.mxu1 %v1241_v1  ;;  %v1248_v5 = vld [vmem:[%s1767_s1 + $0xb0] sm:$0xff]  ;;  %v1247_v8 = vld [vmem:[%s1767_s1 + $0xa8] sm:$0xff] }
   0x4   :  { %695 = vmatpush.bf16.msra.mxu2 %v1249_v2  ;;  %v1230_v9 = vld [vmem:[%s1767_s1 + $0x20] sm:$0xff]  ;;  %v1229_v12 = vld [vmem:[%s1767_s1 + $0x18] sm:$0xff]  ;;  %v1228_v15 = vld [vmem:[%s1767_s1 + $0x10] sm:$0xff] }
   0x5   :  { %v1238_v10 = vld [vmem:[%s1767_s1 + $0x60] sm:$0xff]  ;;  %v1237_v13 = vld [vmem:[%s1767_s1 + $0x58] sm:$0xff] }
   0x6   :  { %638 = vmatpush.bf16.msra.mxu0 %v1232_v3  ;;  %1281 = vmatpush.bf16.msra.mxu3 %v1232_v3  ;;  %v1246_v11 = vld [vmem:[%s1767_s1 + $0xa0] sm:$0xff]  ;;  %v1245_v14 = vld [vmem:[%s1767_s1 + $0x98] sm:$0xff] }
   0x7   :  { %667 = vmatpush.bf16.msra.mxu1 %v1240_v4 }
   0x8   :  { %696 = vmatpush.bf16.msra.mxu2 %v1248_v5 }
   0xa   :  { %639 = vmatpush.bf16.msra.mxu0 %v1231_v6  ;;  %1282 = vmatpush.bf16.msra.mxu3 %v1231_v6 }
   0xb   :  { %668 = vmatpush.bf16.msra.mxu1 %v1239_v7 }
   0xc   :  { %697 = vmatpush.bf16.msra.mxu2 %v1247_v8 }
   0xe   :  { %640 = vmatpush.bf16.msra.mxu0 %v1230_v9  ;;  %1283 = vmatpush.bf16.msra.mxu3 %v1230_v9 }
   0xf   :  { %669 = vmatpush.bf16.msra.mxu1 %v1238_v10 }
  0x10   :  { %698 = vmatpush.bf16.msra.mxu2 %v1246_v11 }
  0x12   :  { %641 = vmatpush.bf16.msra.mxu0 %v1229_v12  ;;  %1284 = vmatpush.bf16.msra.mxu3 %v1229_v12 }
  0x13   :  { %8 = vsyncpa [#allocation3], 0  ;;  %670 = vmatpush.bf16.msra.mxu1 %v1237_v13  ;;  %v1236_v16 = vld [vmem:[%s1767_s1 + $0x50] sm:$0xff]  ;;  %v1227_v18 = vld [vmem:[%s1767_s1 + $0x8] sm:$0xff]  ;;  %vm624_vm0 = vcmask 785408   ;;  %s854_s17 = sshll.u32 %s1769_s3, 4  ;;  %s855_s17 = int_to_ptr.hbm [resolvable:$true] %s854_s17 }
  0x14   :  { %699 = vmatpush.bf16.msra.mxu2 %v1245_v14  ;;  %v1244_v17 = vld [vmem:[%s1767_s1 + $0x90] sm:$0xff]  ;;  %v1235_v19 = vld [vmem:[%s1767_s1 + $0x48] sm:$0xff]  ;;  %v1226_v21 = vld [vmem:[%s1767_s1] sm:$0xff]  ;;  %s1333_s18 = smov 128   ;;  %s1334_s19 = smov 8  }
  0x15   :  { %v1243_v20 = vld [vmem:[%s1767_s1 + $0x88] sm:$0xff]  ;;  %v1234_v22 = vld [vmem:[%s1767_s1 + $0x40] sm:$0xff]  ;;  %v1201_v25 = vld [vmem:[%s1766_s0 + $0x18] sm:$0xf0] }
  0x16   :  { %642 = vmatpush.bf16.msra.mxu0 %v1228_v15  ;;  %1285 = vmatpush.bf16.msra.mxu3 %v1228_v15  ;;  %v1242_v23 = vld [vmem:[%s1767_s1 + $0x80] sm:$0xff]  ;;  %v924_v26 = vld [vmem:[%s1766_s0 + $0x70] sm:$0xf]  ;;  %v1215_v27 = vld [vmem:[%s1766_s0 + $0x88] sm:$0xf0] }
  0x17   :  { %671 = vmatpush.bf16.msra.mxu1 %v1236_v16  ;;  %v868_v24 = vld [vmem:[%s1766_s0] sm:$0xf]  ;;  %v1198_v28 = vld [vmem:[%s1766_s0 + $0x4] sm:$0xf]  ;;  %v876_v30 = vld [vmem:[%s1766_s0 + $0x8] sm:$0xf]  ;;  %v925_v35 = vor.u32 %v1215_v27, %v924_v26 }
  0x18   :  { %700 = vmatpush.bf16.msra.mxu2 %v1244_v17  ;;  %v870_v29 = vld [vmem:[%s1766_s0 + $0x1c] sm:$0xf0]  ;;  %v1202_v31 = vld [vmem:[%s1766_s0 + $0x20] sm:$0xf0]  ;;  %v1257_v32 = vld [vmem:[%s1767_s1 + $0xf8] sm:$0xff]  ;;  %v869_v34 = vor.u32 %v1201_v25, %v868_v24 }
  0x19   :  { %v1457_v33 = vld [vmem:[%s1767_s1 + $0x1a8] sm:$0xff]  ;;  %v873_v36 = vor.u32 %v1198_v28, %v870_v29  ;;  %v877_v37 = vor.u32 %v1202_v31, %v876_v30  ;;  %v1265_v38 = vld [vmem:[%s1767_s1 + $0x138] sm:$0xff]  ;;  %v1256_v40 = vld [vmem:[%s1767_s1 + $0xf0] sm:$0xff] }
  0x1a   :  { %643 = vmatpush.bf16.msra.mxu0 %v1227_v18  ;;  %1286 = vmatpush.bf16.msra.mxu3 %v1227_v18  ;;  %v1465_v39 = vld [vmem:[%s1767_s1 + $0x178] sm:$0xff]  ;;  %v1474_v41 = vld [vmem:[%s1767_s1 + $0x1a0] sm:$0xff]  ;;  %v1264_v42 = vld [vmem:[%s1767_s1 + $0x130] sm:$0xff] }
  0x1b   :  { %672 = vmatpush.bf16.msra.mxu1 %v1235_v19  ;;  %v1483_v43 = vld [vmem:[%s1767_s1 + $0x170] sm:$0xff]  ;;  %v1255_v44 = vld [vmem:[%s1767_s1 + $0xe8] sm:$0xff]  ;;  %v1492_v45 = vld [vmem:[%s1767_s1 + $0x198] sm:$0xff] }
  0x1c   :  { %701 = vmatpush.bf16.msra.mxu2 %v1243_v20  ;;  %v1263_v46 = vld [vmem:[%s1767_s1 + $0x128] sm:$0xff]  ;;  %v1254_v48 = vld [vmem:[%s1767_s1 + $0xe0] sm:$0xff]  ;;  %v1510_v49 = vld [vmem:[%s1767_s1 + $0x190] sm:$0xff] }
  0x1d   :  { %v1501_v47 = vld [vmem:[%s1767_s1 + $0x168] sm:$0xff]  ;;  %v1262_v50 = vld [vmem:[%s1767_s1 + $0x120] sm:$0xff]  ;;  %v896_v51 = vld [vmem:[%s1766_s0 + $0x38] sm:$0xf] }
  0x1e   :  { %644 = vmatpush.bf16.msra.mxu0 %v1226_v21  ;;  %1287 = vmatpush.bf16.msra.mxu3 %v1226_v21  ;;  %v1208_v52 = vld [vmem:[%s1766_s0 + $0x50] sm:$0xf0]  ;;  %v952_v53 = vld [vmem:[%s1766_s0 + $0xa8] sm:$0xf]  ;;  %v1222_v54 = vld [vmem:[%s1766_s0 + $0xc0] sm:$0xf0] }
  0x1f   :  { %673 = vmatpush.bf16.msra.mxu1 %v1234_v22  ;;  %v1205_v55 = vld [vmem:[%s1766_s0 + $0x3c] sm:$0xf]  ;;  %v898_v56 = vld [vmem:[%s1766_s0 + $0x54] sm:$0xf0]  ;;  %v904_v57 = vld [vmem:[%s1766_s0 + $0x40] sm:$0xf]  ;;  %v897_v62 = vor.u32 %v1208_v52, %v896_v51  ;;  %v953_v63 = vor.u32 %v1222_v54, %v952_v53 }
  0x20   :  { %702 = vmatpush.bf16.msra.mxu2 %v1242_v23  ;;  %v1209_v58 = vld [vmem:[%s1766_s0 + $0x58] sm:$0xf0]  ;;  %v1543_v59 = vld [vmem:[%s1767_s1 + $0x160] sm:$0xff]  ;;  %v1552_v61 = vld [vmem:[%s1767_s1 + $0x188] sm:$0xff]  ;;  %v901_v0 = vor.u32 %v1205_v55, %v898_v56 }
  0x21   :  { %645 = vmatmul.bf16.vlgmr.msra.gmra.mxu0 %v869_v34  ;;  %655 = vmatmul.bf16.vlgmr.msra.gmra.mxu3 %v925_v35  ;;  %v1253_v60 = vld [vmem:[%s1767_s1 + $0xd8] sm:$0xff]  ;;  %v905_v1 = vor.u32 %v1209_v58, %v904_v57  ;;  %v1252_v4 = vld [vmem:[%s1767_s1 + $0xd0] sm:$0xff]  ;;  %v1274_v7 = vld [vmem:[%s1767_s1 + $0x180] sm:$0xff] }
  0x22   :  { %724 = vmatpush.bf16.msrb.mxu3 %v1257_v32  ;;  %674 = vmatmul.bf16.vlgmr.msra.gmra.mxu1 %v873_v36  ;;  %v1261_v2 = vld [vmem:[%s1767_s1 + $0x118] sm:$0xff]  ;;  %v1260_v5 = vld [vmem:[%s1767_s1 + $0x110] sm:$0xff]  ;;  %v1251_v8 = vld [vmem:[%s1767_s1 + $0xc8] sm:$0xff] }
  0x23   :  { %703 = vmatmul.bf16.vlgmr.msra.gmra.mxu2 %v877_v37  ;;  %753 = vmatpush.bf16.msrb.mxu0 %v1265_v38  ;;  %v1561_v3 = vld [vmem:[%s1767_s1 + $0x158] sm:$0xff]  ;;  %v1268_v6 = vld [vmem:[%s1767_s1 + $0x150] sm:$0xff]  ;;  %v1259_v9 = vld [vmem:[%s1767_s1 + $0x108] sm:$0xff] }
  0x24   :  { %813 = vmatpush.bf16.msrb.mxu2 %v1457_v33  ;;  %1288 = vmatpush.bf16.msrb.mxu1 %v1465_v39  ;;  %v1267_v10 = vld [vmem:[%s1767_s1 + $0x148] sm:$0xff]  ;;  %v1250_v11 = vld [vmem:[%s1767_s1 + $0xc0] sm:$0xff]  ;;  %v1212_v13 = vld [vmem:[%s1766_s0 + $0x74] sm:$0xf] }
  0x25   :  { %v1258_v12 = vld [vmem:[%s1767_s1 + $0x100] sm:$0xff]  ;;  %v926_v14 = vld [vmem:[%s1766_s0 + $0x8c] sm:$0xf0]  ;;  %v1199_v15 = vld [vmem:[%s1766_s0 + $0xc] sm:$0xf] }
  0x26   :  { %725 = vmatpush.bf16.msrb.mxu3 %v1256_v40  ;;  %v878_v16 = vld [vmem:[%s1766_s0 + $0x24] sm:$0xf0]  ;;  %v932_v17 = vld [vmem:[%s1766_s0 + $0x78] sm:$0xf]  ;;  %v1216_v18 = vld [vmem:[%s1766_s0 + $0x90] sm:$0xf0]  ;;  %v929_v23 = vor.u32 %v1212_v13, %v926_v14 }
  0x27   :  { %754 = vmatpush.bf16.msrb.mxu0 %v1264_v42  ;;  %v1266_v19 = vld [vmem:[%s1767_s1 + $0x140] sm:$0xff]  ;;  %v884_v20 = vld [vmem:[%s1766_s0 + $0x10] sm:$0xf]  ;;  %v1203_v21 = vld [vmem:[%s1766_s0 + $0x28] sm:$0xf0]  ;;  %v881_v22 = vor.u32 %v1199_v15, %v878_v16  ;;  %v933_v24 = vor.u32 %v1216_v18, %v932_v17 }
  0x28   :  { %814 = vmatpush.bf16.msrb.mxu2 %v1474_v41  ;;  %1289 = vmatpush.bf16.msrb.mxu1 %v1483_v43  ;;  %v885_v25 = vor.u32 %v1203_v21, %v884_v20  ;;  %v1219_v26 = vld [vmem:[%s1766_s0 + $0xac] sm:$0xf]  ;;  %v1206_v27 = vld [vmem:[%s1766_s0 + $0x44] sm:$0xf]  ;;  %v906_v28 = vld [vmem:[%s1766_s0 + $0x5c] sm:$0xf0] }
  0x29   :  { %v954_v29 = vld [vmem:[%s1766_s0 + $0xc4] sm:$0xf0]  ;;  %v960_v30 = vld [vmem:[%s1766_s0 + $0xb0] sm:$0xf]  ;;  %v1223_v31 = vld [vmem:[%s1766_s0 + $0xc8] sm:$0xf0]  ;;  %v909_v34 = vor.u32 %v1206_v27, %v906_v28 }
  0x2a   :  { %726 = vmatpush.bf16.msrb.mxu3 %v1255_v44  ;;  %v912_v32 = vld [vmem:[%s1766_s0 + $0x48] sm:$0xf]  ;;  %v957_v35 = vor.u32 %v1219_v26, %v954_v29  ;;  %v961_v36 = vor.u32 %v1223_v31, %v960_v30  ;;  %v1213_v38 = vld [vmem:[%s1766_s0 + $0x7c] sm:$0xf]  ;;  %v1207_v40 = vld [vmem:[%s1766_s0 + $0x4c] sm:$0xf] }
  0x2b   :  { %755 = vmatpush.bf16.msrb.mxu0 %v1263_v46  ;;  %v892_v42 = vld [vmem:[%s1766_s0 + $0x18] sm:$0xf]  ;;  %v940_v44 = vld [vmem:[%s1766_s0 + $0x80] sm:$0xf]  ;;  %v962_v51 = vld [vmem:[%s1766_s0 + $0xcc] sm:$0xf0] }
  0x2c   :  { %815 = vmatpush.bf16.msrb.mxu2 %v1492_v45  ;;  %1290 = vmatpush.bf16.msrb.mxu1 %v1501_v47  ;;  %v1214_v52 = vld [vmem:[%s1766_s0 + $0x84] sm:$0xf]  ;;  %v942_v53 = vld [vmem:[%s1766_s0 + $0x9c] sm:$0xf0]  ;;  %v920_v54 = vld [vmem:[%s1766_s0 + $0x50] sm:$0xf] }
  0x2d   :  { %v1211_v55 = vld [vmem:[%s1766_s0 + $0x68] sm:$0xf0]  ;;  %v968_v56 = vld [vmem:[%s1766_s0 + $0xb8] sm:$0xf]  ;;  %v1224_v57 = vld [vmem:[%s1766_s0 + $0xd0] sm:$0xf0] }
  0x2e   :  { %727 = vmatpush.bf16.msrb.mxu3 %v1254_v48 }
  0x2f   :  { %756 = vmatpush.bf16.msrb.mxu0 %v1262_v50  ;;  %v1220_v50 = vld [vmem:[%s1766_s0 + $0xb4] sm:$0xf] }
  0x30   :  { %816 = vmatpush.bf16.msrb.mxu2 %v1510_v49  ;;  %1291 = vmatpush.bf16.msrb.mxu1 %v1543_v59  ;;  %v965_v58 = vor.u32 %v1220_v50, %v962_v51 }
  0x31   :  { %650 = vmatmul.bf16.gmra.mxu0 %v897_v62  ;;  %660 = vmatmul.bf16.gmra.mxu3 %v953_v63  ;;  %v1221_v62 = vld [vmem:[%s1766_s0 + $0xbc] sm:$0xf]  ;;  %v976_v63 = vld [vmem:[%s1766_s0 + $0xc0] sm:$0xf] }
  0x32   :  { %728 = vmatpush.bf16.msrb.mxu3 %v1253_v60  ;;  %679 = vmatmul.bf16.gmra.mxu1 %v901_v0  ;;  %v921_v60 = vor.u32 %v1211_v55, %v920_v54  ;;  %v1225_v0 = vld [vmem:[%s1766_s0 + $0xd8] sm:$0xf0] }
  0x33   :  { %708 = vmatmul.bf16.gmra.mxu2 %v905_v1  ;;  %757 = vmatpush.bf16.msrb.mxu0 %v1261_v2  ;;  %v970_v1 = vld [vmem:[%s1766_s0 + $0xd4] sm:$0xf0]  ;;  %v948_v2 = vld [vmem:[%s1766_s0 + $0x88] sm:$0xf] }
  0x34   :  { %817 = vmatpush.bf16.msrb.mxu2 %v1552_v61  ;;  %1292 = vmatpush.bf16.msrb.mxu1 %v1561_v3 }
  0x36   :  { %729 = vmatpush.bf16.msrb.mxu3 %v1252_v4  ;;  %v1200_v4 = vld [vmem:[%s1766_s0 + $0x14] sm:$0xf] }
  0x37   :  { %758 = vmatpush.bf16.msrb.mxu0 %v1260_v5  ;;  %v886_v5 = vld [vmem:[%s1766_s0 + $0x2c] sm:$0xf0] }
  0x38   :  { %818 = vmatpush.bf16.msrb.mxu2 %v1274_v7  ;;  %1293 = vmatpush.bf16.msrb.mxu1 %v1268_v6 }
  0x3a   :  { %730 = vmatpush.bf16.msrb.mxu3 %v1251_v8 }
  0x3b   :  { %759 = vmatpush.bf16.msrb.mxu0 %v1259_v9  ;;  %v889_v9 = vor.u32 %v1200_v4, %v886_v5 }
  0x3c   :  { %1294 = vmatpush.bf16.msrb.mxu1 %v1267_v10 }
  0x3e   :  { %731 = vmatpush.bf16.msrb.mxu3 %v1250_v11 }
  0x3f   :  { %760 = vmatpush.bf16.msrb.mxu0 %v1258_v12 }
  0x40   :  { %1295 = vmatpush.bf16.msrb.mxu1 %v1266_v19 }
  0x41   :  { %732 = vmatmul.bf16.vlgmr.msrb.gmra.mxu3 %v881_v22 }
  0x42   :  { %1296 = vmatpush.bf16.msra.mxu3 %v1457_v33  ;;  %684 = vmatmul.bf16.gmra.mxu1 %v929_v23  ;;  %v1210_v33 = vld [vmem:[%s1766_s0 + $0x60] sm:$0xf0] }
  0x43   :  { %782 = vmatpush.bf16.msra.mxu0 %v1465_v39  ;;  %713 = vmatmul.bf16.gmra.mxu2 %v933_v24  ;;  %v913_v37 = vor.u32 %v1210_v33, %v912_v32  ;;  %v934_v39 = vld [vmem:[%s1766_s0 + $0x94] sm:$0xf0] }
  0x44   :  { %761 = vmatmul.bf16.vlgmr.msrb.gmra.mxu0 %v885_v25  ;;  %v937_v46 = vor.u32 %v1213_v38, %v934_v39 }
  0x46   :  { %1297 = vmatpush.bf16.msra.mxu3 %v1474_v41  ;;  %v914_v41 = vld [vmem:[%s1766_s0 + $0x64] sm:$0xf0] }
  0x47   :  { %783 = vmatpush.bf16.msra.mxu0 %v1483_v43  ;;  %v1204_v43 = vld [vmem:[%s1766_s0 + $0x30] sm:$0xf0] }
  0x48   :  { %v893_v48 = vor.u32 %v1204_v43, %v892_v42 }
  0x4a   :  { %1298 = vmatpush.bf16.msra.mxu3 %v1492_v45  ;;  %v1217_v45 = vld [vmem:[%s1766_s0 + $0x98] sm:$0xf0] }
  0x4b   :  { %784 = vmatpush.bf16.msra.mxu0 %v1501_v47  ;;  %v917_v47 = vor.u32 %v1207_v40, %v914_v41 }
  0x4e   :  { %1299 = vmatpush.bf16.msra.mxu3 %v1510_v49  ;;  %v941_v49 = vor.u32 %v1217_v45, %v940_v44 }
  0x4f   :  { %785 = vmatpush.bf16.msra.mxu0 %v1543_v59  ;;  %v945_v59 = vor.u32 %v1214_v52, %v942_v53 }
  0x51   :  { %737 = vmatmul.bf16.gmra.mxu3 %v909_v34 }
  0x52   :  { %1300 = vmatpush.bf16.msra.mxu3 %v1552_v61  ;;  %689 = vmatmul.bf16.gmra.mxu1 %v957_v35  ;;  %v969_v61 = vor.u32 %v1224_v57, %v968_v56 }
  0x53   :  { %786 = vmatpush.bf16.msra.mxu0 %v1561_v3  ;;  %718 = vmatmul.bf16.gmra.mxu2 %v961_v36  ;;  %v1218_v3 = vld [vmem:[%s1766_s0 + $0xa0] sm:$0xf0]  ;;  %s1332_s0 = smov [#allocation2]  }
  0x54   :  { %766 = vmatmul.bf16.gmra.mxu0 %v913_v37  ;;  %v949_v8 = vor.u32 %v1218_v3, %v948_v2 }
  0x56   :  { %1301 = vmatpush.bf16.msra.mxu3 %v1274_v7  ;;  %v973_v7 = vor.u32 %v1221_v62, %v970_v1 }
  0x57   :  { %787 = vmatpush.bf16.msra.mxu0 %v1268_v6  ;;  %v977_v6 = vor.u32 %v1225_v0, %v976_v63 }
  0x5b   :  { %788 = vmatpush.bf16.msra.mxu0 %v1267_v10  ;;  %v1732_v10 = vld [vmem:[%s1768_s2] ss:$0 sm:$0xff]  ;;  %s852_s2 = sshll.u32 %s1332_s0, 4  ;;  %s853_s2 = int_to_ptr.vmem [resolvable:$true] %s852_s2 }
  0x5f   :  { %789 = vmatpush.bf16.msra.mxu0 %v1266_v19 }
  0x61   :  { %742 = vmatmul.bf16.gmra.mxu3 %v937_v46 }
  0x62   :  { %795 = vmatmul.bf16.vlgmr.msrb.gmra.mxu1 %v917_v47 }
  0x63   :  { %1194 = vmatmul.msk.bf16.vlgmr.msrb.gmra.mxu2 %vm624_vm0, %v893_v48 }
  0x64   :  { %771 = vmatmul.bf16.gmra.mxu0 %v941_v49 }
  0x71   :  { %747 = vmatmul.bf16.gmra.mxu3 %v965_v58 }
  0x72   :  { %800 = vmatmul.bf16.gmra.mxu1 %v945_v59 }
  0x73   :  { %1195 = vmatmul.msk.bf16.gmra.mxu2 %vm624_vm0, %v921_v60 }
  0x74   :  { %776 = vmatmul.bf16.gmra.mxu0 %v969_v61 }
  0x81   :  { %1197 = vmatmul.msk.bf16.vlgmr.msra.gmra.mxu3 %vm624_vm0, %v977_v6 }
  0x82   :  { %805 = vmatmul.bf16.gmra.mxu1 %v973_v7 }
  0x83   :  { %1196 = vmatmul.msk.bf16.gmra.mxu2 %vm624_vm0, %v949_v8 }
  0x84   :  { %790 = vmatmul.bf16.vlgmr.msra.gmra.mxu0 %v889_v9 }
  0x9e   :  { %v646_v11 = vpop.f32.mrf.mxu0 }
  0x9f   :  { %v647_v12 = vadd.f32 %v1732_v10, %v646_v11  ;;  %v675_v13 = vpop.f32.mrf.mxu1 }
  0xa1   :  { %v676_v14 = vadd.f32 %v675_v13, %v647_v12 }
  0xa4   :  { %v656_v15 = vpop.f32.mrf.mxu3 }
  0xa5   :  { %v657_v11 = vadd.f32 %v1732_v10, %v656_v15 }
  0xa6   :  { %v704_v16 = vpop.f32.mrf.mxu2  ;;  %v648_v18 = vpop.f32.mrf.mxu0 }
  0xa7   :  { %v1735_v17 = vadd.f32 %v704_v16, %v676_v14  ;;  %v649_v19 = vadd.f32 %v1732_v10, %v648_v18  ;;  %v677_v20 = vpop.f32.mrf.mxu1 }
  0xa9   :  { %v678_v21 = vadd.f32 %v677_v20, %v649_v19 }
  0xac   :  { %v1738_v22 = vpop.f32.mrf.mxu3 }
  0xad   :  { %v659_v15 = vadd.f32 %v1732_v10, %v1738_v22 }
  0xae   :  { %v706_v23 = vpop.f32.mrf.mxu2  ;;  %v651_v25 = vpop.f32.mrf.mxu0 }
  0xaf   :  { %v1740_v24 = vadd.f32 %v706_v23, %v678_v21  ;;  %v680_v26 = vpop.f32.mrf.mxu1  ;;  %v652_v51 = vadd.f32 %v1732_v10, %v651_v25 }
  0xb1   :  { %v681_v55 = vadd.f32 %v680_v26, %v652_v51 }
  0xb4   :  { %v661_v27 = vpop.f32.mrf.mxu3 }
  0xb5   :  { %v662_v8 = vadd.f32 %v1732_v10, %v661_v27 }
  0xb6   :  { %v709_v28 = vpop.f32.mrf.mxu2  ;;  %v653_v29 = vpop.f32.mrf.mxu0 }
  0xb7   :  { %v682_v30 = vpop.f32.mrf.mxu1  ;;  %v710_v57 = vadd.f32 %v709_v28, %v681_v55  ;;  %v654_v60 = vadd.f32 %v1732_v10, %v653_v29 }
  0xb9   :  { %v683_v0 = vadd.f32 %v682_v30, %v654_v60 }
  0xbc   :  { %v663_v31 = vpop.f32.mrf.mxu3 }
  0xbd   :  { %v664_v27 = vadd.f32 %v1732_v10, %v663_v31 }
  0xbe   :  { %v711_v32 = vpop.f32.mrf.mxu2 }
  0xbf   :  { %v685_v33 = vpop.f32.mrf.mxu1  ;;  %v712_v2 = vadd.f32 %v711_v32, %v683_v0 }
  0xc0   :  { %v686_v14 = vadd.f32 %v685_v33, %v657_v11 }
  0xc1   :  { %v762_v34 = vpop.f32.mrf.mxu0 }
  0xc4   :  { %v733_v35 = vpop.f32.mrf.mxu3 }
  0xc5   :  { %v734_v18 = vadd.f32 %v733_v35, %v1735_v17 }
  0xc6   :  { %v714_v36 = vpop.f32.mrf.mxu2 }
  0xc7   :  { %v687_v37 = vpop.f32.mrf.mxu1  ;;  %v715_v20 = vadd.f32 %v714_v36, %v686_v14  ;;  %v763_v30 = vadd.f32 %v762_v34, %v734_v18 }
  0xc8   :  { %v688_v35 = vadd.f32 %v687_v37, %v659_v15 }
  0xc9   :  { %v1742_v38 = vpop.f32.mrf.mxu0 }
  0xcc   :  { %v735_v39 = vpop.f32.mrf.mxu3 }
  0xce   :  { %v1744_v40 = vpop.f32.mrf.mxu2 }
  0xcf   :  { %v690_v41 = vpop.f32.mrf.mxu1 }
  0xd0   :  { %v691_v13 = vadd.f32 %v690_v41, %v662_v8 }
  0xd1   :  { %v767_v42 = vpop.f32.mrf.mxu0 }
  0xd4   :  { %v738_v43 = vpop.f32.mrf.mxu3 }
  0xd5   :  { %v739_v61 = vadd.f32 %v738_v43, %v710_v57  ;;  %v736_v43 = vadd.f32 %v735_v39, %v1740_v24 }
  0xd6   :  { %v719_v44 = vpop.f32.mrf.mxu2 }
  0xd7   :  { %v692_v45 = vpop.f32.mrf.mxu1  ;;  %v768_v1 = vadd.f32 %v767_v42, %v739_v61  ;;  %v720_v19 = vadd.f32 %v719_v44, %v691_v13 }
  0xd8   :  { %v693_v41 = vadd.f32 %v692_v45, %v664_v27  ;;  %v765_v45 = vadd.f32 %v1742_v38, %v736_v43 }
  0xd9   :  { %v769_v46 = vpop.f32.mrf.mxu0 }
  0xdc   :  { %v740_v47 = vpop.f32.mrf.mxu3 }
  0xdd   :  { %v741_v6 = vadd.f32 %v740_v47, %v712_v2 }
  0xde   :  { %v721_v48 = vpop.f32.mrf.mxu2 }
  0xdf   :  { %v796_v49 = vpop.f32.mrf.mxu1  ;;  %v770_v16 = vadd.f32 %v769_v46, %v741_v6  ;;  %v722_v44 = vadd.f32 %v721_v48, %v693_v41 }
  0xe0   :  { %v797_v3 = vadd.f32 %v796_v49, %v768_v1  ;;  %v717_v49 = vadd.f32 %v1744_v40, %v688_v35 }
  0xe1   :  { %v772_v50 = vpop.f32.mrf.mxu0 }
  0xe4   :  { %v743_v52 = vpop.f32.mrf.mxu3 }
  0xe5   :  { %v744_v28 = vadd.f32 %v743_v52, %v715_v20 }
  0xe6   :  { %v820_v53 = vpop.f32.mrf.mxu2 }
  0xe7   :  { %v798_v54 = vpop.f32.mrf.mxu1  ;;  %v773_v36 = vadd.f32 %v772_v50, %v744_v28 }
  0xe8   :  { %v799_v21 = vadd.f32 %v798_v54, %v770_v16 }
  0xe9   :  { %v1747_v56 = vpop.f32.mrf.mxu0 }
  0xec   :  { %v745_v58 = vpop.f32.mrf.mxu3 }
  0xed   :  { %v746_v22 = vadd.f32 %v745_v58, %v717_v49 }
  0xee   :  { %v1749_v59 = vpop.f32.mrf.mxu2 }
  0xef   :  { %v801_v62 = vpop.f32.mrf.mxu1  ;;  %v775_v48 = vadd.f32 %v1747_v56, %v746_v22 }
  0xf0   :  { %v802_v31 = vadd.f32 %v801_v62, %v773_v36 }
  0xf1   :  { %v777_v63 = vpop.f32.mrf.mxu0 }
  0xf4   :  { %v748_v4 = vpop.f32.mrf.mxu3 }
  0xf5   :  { %v749_v25 = vadd.f32 %v748_v4, %v720_v19 }
  0xf6   :  { %v825_v5 = vpop.f32.mrf.mxu2 }
  0xf7   :  { %v826_v7 = vadd.f32 %v825_v5, %v797_v3  ;;  %v803_v9 = vpop.f32.mrf.mxu1  ;;  %v778_v17 = vadd.f32 %v777_v63, %v749_v25 }
  0xf8   :  { %v804_v55 = vadd.f32 %v803_v9, %v775_v48 }
  0xf9   :  { %842 = vst [vmem:[#allocation2 + $0x10] sm:$0xff] %v826_v7  ;;  %v779_v12 = vpop.f32.mrf.mxu0 }
  0xfc   :  { %v750_v23 = vpop.f32.mrf.mxu3 }
  0xfd   :  { %v751_v51 = vadd.f32 %v750_v23, %v722_v44 }
  0xfe   :  { %v827_v26 = vpop.f32.mrf.mxu2 }
  0xff   :  { %v828_v29 = vadd.f32 %v827_v26, %v799_v21  ;;  %v806_v32 = vpop.f32.mrf.mxu1  ;;  %v780_v39 = vadd.f32 %v779_v12, %v751_v51 }
 0x100   :  { %v807_v47 = vadd.f32 %v806_v32, %v778_v17 }
 0x101   :  { %843 = vst [vmem:[#allocation2 + $0x18] sm:$0xff] %v828_v29  ;;  %v791_v33 = vpop.f32.mrf.mxu0 }
 0x102   :  { %v792_v42 = vadd.f32 %v791_v33, %v763_v30 }
 0x104   :  { %v821_v46 = vadd.f32 %v820_v53, %v792_v42  ;;  %v835_v34 = vpop.f32.mrf.mxu3 }
 0x105   :  { %v836_v10 = vadd.f32 %v835_v34, %v807_v47 }
 0x106   :  { %840 = vst [vmem:[#allocation2] sm:$0xff] %v821_v46  ;;  %v830_v52 = vpop.f32.mrf.mxu2 }
 0x107   :  { %v831_v54 = vadd.f32 %v830_v52, %v802_v31  ;;  %846 = vst [vmem:[#allocation2 + $0x30] sm:$0xff] %v836_v10  ;;  %v808_v50 = vpop.f32.mrf.mxu1 }
 0x108   :  { %v809_v53 = vadd.f32 %v808_v50, %v780_v39 }
 0x109   :  { %844 = vst [vmem:[#allocation2 + $0x20] sm:$0xff] %v831_v54  ;;  %v793_v37 = vpop.f32.mrf.mxu0 }
 0x10a   :  { %v794_v24 = vadd.f32 %v793_v37, %v765_v45 }
 0x10c   :  { %v823_v40 = vadd.f32 %v1749_v59, %v794_v24  ;;  %v837_v57 = vpop.f32.mrf.mxu3 }
 0x10d   :  { %v838_v58 = vadd.f32 %v837_v57, %v809_v53 }
 0x10e   :  { %841 = vst [vmem:[#allocation2 + $0x8] sm:$0xff] %v823_v40  ;;  %v832_v38 = vpop.f32.mrf.mxu2 }
 0x10f   :  { %v833_v60 = vadd.f32 %v832_v38, %v804_v55  ;;  %847 = vst [vmem:[#allocation2 + $0x38] sm:$0xff] %v838_v58 }
 0x111   :  { %845 = vst [vmem:[#allocation2 + $0x28] sm:$0xff] %v833_v60 }
 0x112   :  { %860 = dma.vmem_to_hbm [thread:$0]  %s853_s2, 1024, %s855_s17, [#allocation3], %s1333_s18, %s1333_s18, %s1334_s19  }
 0x113   :  { %1330 = dma.done.wait [#allocation3], 1024  }
 0x114   :  { %1331 = vsyncadd [#allocation3], 4294966272 }
 0x115   :  { %865 = vsyncpa [#allocation3], 1 }

</bundles_post_ra>
